<compile_context>
chip_gen: v6e
topology: v6e:2x2x1
jax: 0.10.0
libtpu: 0.0.40
codegen_flags: <defaults>
</compile_context>

<pallas_src>
import functools

import jax
import jax.numpy as jnp
from jax import lax
from jax.experimental import pallas as pl
from jax.experimental.pallas import tpu as pltpu

_LANE = 128
_SUBLANE = 8


def _round_down(x, m):
    return max(m, (x // m) * m)


def _kernel_batch_on_lanes(x_ref, t_ref, out_ref, acc_ref, *, n_rows, tile_cols, inner_steps):
    """Tiles are (C, tile_cols): classes on sublanes, batch on lanes (small-C path)."""
    p = pl.program_id(0)
    i = pl.program_id(1)

    @pl.when(i == 0)
    def _():
        acc_ref[...] = jnp.zeros_like(acc_ref)

    x = x_ref[...].astype(jnp.float32)  # (C, TB)
    t = t_ref[...].astype(jnp.float32)
    n_cls = x.shape[0]

    cls_idx = lax.broadcasted_iota(jnp.int32, x.shape, 0)

    def argmax_over_classes(v):
        m = jnp.max(v, axis=0, keepdims=True)
        # first-occurrence tie-breaking (matches torch.argmax / jnp.argmax)
        return jnp.min(jnp.where(v == m, cls_idx, jnp.int32(n_cls)), axis=0, keepdims=True)

    blk = p * inner_steps + i
    lane_idx = lax.broadcasted_iota(jnp.int32, (1, tile_cols), 1)
    valid = (blk * tile_cols + lane_idx) < n_rows  # mask padded / out-of-range columns

    match = argmax_over_classes(x) == argmax_over_classes(t)  # (1, TB) bool
    acc_ref[...] += jnp.where(valid & match, 1.0, 0.0).astype(jnp.float32)

    @pl.when(i == inner_steps - 1)
    def _():
        out_ref[...] = jnp.zeros_like(out_ref) + jnp.sum(acc_ref[...])


def _kernel_class_on_lanes(x_ref, t_ref, out_ref, acc_ref, *, n_rows, tile_rows, inner_steps):
    """Tiles are (tile_rows, C): batch on sublanes, classes on lanes (large-C path)."""
    p = pl.program_id(0)
    i = pl.program_id(1)

    @pl.when(i == 0)
    def _():
        acc_ref[...] = jnp.zeros_like(acc_ref)

    x = x_ref[...].astype(jnp.float32)  # (TB, C)
    t = t_ref[...].astype(jnp.float32)
    n_cls = x.shape[1]

    cls_idx = lax.broadcasted_iota(jnp.int32, x.shape, 1)

    def argmax_over_classes(v):
        m = jnp.max(v, axis=1, keepdims=True)
        return jnp.min(jnp.where(v == m, cls_idx, jnp.int32(n_cls)), axis=1, keepdims=True)

    blk = p * inner_steps + i
    row_idx = lax.broadcasted_iota(jnp.int32, (tile_rows, 1), 0)
    valid = (blk * tile_rows + row_idx) < n_rows  # mask padded / out-of-range rows

    match = argmax_over_classes(x) == argmax_over_classes(t)  # (TB, 1) bool
    acc_ref[...] += jnp.where(valid & match, 1.0, 0.0).astype(jnp.float32)

    @pl.when(i == inner_steps - 1)
    def _():
        out_ref[...] = jnp.zeros_like(out_ref) + jnp.sum(acc_ref[...])


def squared_accuracy(inputs, targets, *, target_tile_bytes=2 * 1024 * 1024):
    """(input.argmax(1) == target.argmax(1)).float().sum() for 2-D (N, C) arrays."""
    N, C = inputs.shape
    assert targets.shape == (N, C)
    itemsize = jnp.dtype(inputs.dtype).itemsize

    small_c = C <= _LANE

    if small_c:
        # Batch on lanes: operate on transposed (C, N) arrays, tile the lane (batch) axis.
        x, t = inputs.T, targets.T
        tile = _round_down(target_tile_bytes // max(1, C * itemsize), _LANE)
        tile = min(tile, 16384)
        if N <= tile:
            tile = N  # full-extent block: exempt from the (8,128) divisibility rule
        total_blocks = pl.cdiv(N, tile)
        n_parallel = 2 if total_blocks >= 2 else 1
        inner = pl.cdiv(total_blocks, n_parallel)

        def blk_idx(p, i):
            return jnp.minimum(p * inner + i, total_blocks - 1)  # clamp padded partitions

        kernel = functools.partial(
            _kernel_batch_on_lanes, n_rows=N, tile_cols=tile, inner_steps=inner)
        in_spec = pl.BlockSpec((C, tile), lambda p, i: (0, blk_idx(p, i)))
        scratch = pltpu.VMEM((1, tile), jnp.float32)
        tile_bytes = C * tile * itemsize
    else:
        # Classes on lanes: tile the batch (sublane) axis with large row tiles.
        x, t = inputs, targets
        tile = _round_down(target_tile_bytes // max(1, C * itemsize), _SUBLANE)
        tile = min(tile, 2048)
        if N <= tile:
            tile = N
        total_blocks = pl.cdiv(N, tile)
        n_parallel = 2 if total_blocks >= 2 else 1
        inner = pl.cdiv(total_blocks, n_parallel)

        def blk_idx(p, i):
            return jnp.minimum(p * inner + i, total_blocks - 1)

        kernel = functools.partial(
            _kernel_class_on_lanes, n_rows=N, tile_rows=tile, inner_steps=inner)
        in_spec = pl.BlockSpec((tile, C), lambda p, i: (blk_idx(p, i), 0))
        scratch = pltpu.VMEM((tile, 1), jnp.float32)
        tile_bytes = tile * C * itemsize

    # Double-buffered: 2 inputs x 2 buffers x tile, plus headroom; safe on all generations
    # (stays well under v7x's 64 MiB physical VMEM).
    vmem_limit = int(min(max(32 * 1024 * 1024, 4 * tile_bytes + (8 << 20)), 56 * 1024 * 1024))

    partials = pl.pallas_call(
        kernel,
        # One lane-dense (8,128) slab per parallel partition, broadcast-filled with its count.
        out_shape=jax.ShapeDtypeStruct((n_parallel, 8, 128), jnp.float32),
        grid_spec=pltpu.PrefetchScalarGridSpec(
            num_scalar_prefetch=0,
            grid=(n_parallel, inner),
            in_specs=[in_spec, in_spec],
            out_specs=pl.BlockSpec((1, 8, 128), lambda p, i: (p, 0, 0)),
            scratch_shapes=[scratch],
        ),
        compiler_params=pltpu.CompilerParams(
            dimension_semantics=("parallel", "arbitrary"),
            vmem_limit_bytes=vmem_limit,
        ),
    )(x, t)
    return partials[:, 0, 0].sum()


def _reference(inputs, targets):
    return jnp.sum(
        (jnp.argmax(inputs, axis=1) == jnp.argmax(targets, axis=1)).astype(jnp.float32))


if __name__ == "__main__":
    key = jax.random.PRNGKey(0)
    k1, k2, k3, k4, k5, k6 = jax.random.split(key, 6)

    # Primary example: small shapes consistent with the module (logits + one-hot targets).
    N, C = 16, 10
    logits = jax.random.normal(k1, (N, C), dtype=jnp.float32)
    labels = jax.random.randint(k2, (N,), 0, C)
    targets = jax.nn.one_hot(labels, C, dtype=jnp.float32)

    result = jax.block_until_ready(squared_accuracy(logits, targets))
    assert jnp.allclose(result, _reference(logits, targets)), (result, _reference(logits, targets))

    # Exercise the small-C multi-block / masked-tail / two-partition path.
    x2 = jax.random.normal(k3, (1000, 10), dtype=jnp.float32)
    t2 = jax.random.normal(k4, (1000, 10), dtype=jnp.float32)
    r2 = jax.block_until_ready(squared_accuracy(x2, t2, target_tile_bytes=8 * 1024))
    assert jnp.allclose(r2, _reference(x2, t2)), (r2, _reference(x2, t2))

    # Exercise the large-C (classes-on-lanes) multi-block / masked-tail path.
    x3 = jax.random.normal(k5, (1000, 200), dtype=jnp.float32)
    t3 = jax.random.normal(k6, (1000, 200), dtype=jnp.float32)
    r3 = jax.block_until_ready(squared_accuracy(x3, t3, target_tile_bytes=64 * 1024))
    assert jnp.allclose(r3, _reference(x3, t3)), (r3, _reference(x3, t3))

    print("KERNEL_OK")
</pallas_src>

<mosaic_0001>
module attributes {stable_mosaic.version = 11 : i64} {
  func.func @_kernel_batch_on_lanes(%arg0: i32, %arg1: i32, %arg2: memref<10x16xf32, #tpu.memory_space<vmem>>, %arg3: memref<10x16xf32, #tpu.memory_space<vmem>>, %arg4: memref<1x8x128xf32, #tpu.memory_space<vmem>>, %arg5: memref<1x16xf32, #tpu.memory_space<vmem>>) attributes {dimension_semantics = [#tpu.dimension_semantics<parallel>, #tpu.dimension_semantics<arbitrary>], iteration_bounds = array<i64: 1, 1>, scalar_prefetch = 0 : i64, scratch_operands = 1 : i64, tpu.core_type = #tpu.core_type<tc>, window_params = [{transform_indices = @transform_0, window_bounds = array<i64: 10, 16>}, {transform_indices = @transform_1, window_bounds = array<i64: 10, 16>}, {transform_indices = @transform_2, window_bounds = array<i64: 1, 8, 128>}]} {
    %c0_i32 = arith.constant 0 : i32
    %0 = arith.cmpi eq, %arg1, %c0_i32 : i32
    %1 = arith.extui %0 : i1 to i32
    %c0_i32_0 = arith.constant 0 : i32
    %2 = arith.cmpi ne, %1, %c0_i32_0 : i32
    scf.if %2 {
      %cst_17 = arith.constant 0.000000e+00 : f32
      %41 = vector.broadcast %cst_17 : f32 to vector<1x16xf32>
      %c0_18 = arith.constant 0 : index
      %c0_19 = arith.constant 0 : index
      %42 = vector.load %arg5[%c0_18, %c0_19] : memref<1x16xf32, #tpu.memory_space<vmem>>, vector<1x16xf32>
      tpu.vector_store %arg5[%c0_18, %c0_19], %41 {strides = array<i32>} : memref<1x16xf32, #tpu.memory_space<vmem>>, vector<1x16xf32>,
    } else {
    }
    %c0 = arith.constant 0 : index
    %c0_1 = arith.constant 0 : index
    %3 = vector.load %arg2[%c0, %c0_1] : memref<10x16xf32, #tpu.memory_space<vmem>>, vector<10x16xf32>
    %c0_2 = arith.constant 0 : index
    %c0_3 = arith.constant 0 : index
    %4 = vector.load %arg3[%c0_2, %c0_3] : memref<10x16xf32, #tpu.memory_space<vmem>>, vector<10x16xf32>
    %5 = tpu.iota {dimensions = array<i32: 0>} : vector<10x16xi32>
    %c1_i32 = arith.constant 1 : i32
    %6 = arith.muli %arg0, %c1_i32 : i32
    %7 = arith.addi %6, %arg1 : i32
    %8 = tpu.iota {dimensions = array<i32: 1>} : vector<1x16xi32>
    %c16_i32 = arith.constant 16 : i32
    %9 = arith.muli %7, %c16_i32 : i32
    %10 = vector.broadcast %9 : i32 to vector<1x16xi32>
    %11 = arith.addi %10, %8 : vector<1x16xi32>
    %c16_i32_4 = arith.constant 16 : i32
    %12 = vector.broadcast %c16_i32_4 : i32 to vector<1x16xi32>
    %13 = arith.cmpi slt, %11, %12 : vector<1x16xi32>
    %cst = arith.constant dense<0xFF800000> : vector<16xf32>
    %14 = vector.multi_reduction <maximumf>, %3, %cst [0] : vector<10x16xf32> to vector<16xf32>
    %15 = vector.shape_cast %14 : vector<16xf32> to vector<1x16xf32>
    %16 = vector.broadcast %15 : vector<1x16xf32> to vector<10x16xf32>
    %17 = arith.cmpf oeq, %3, %16 : vector<10x16xf32>
    %c10_i32 = arith.constant 10 : i32
    %18 = vector.broadcast %c10_i32 : i32 to vector<10x16xi32>
    %19 = arith.select %17, %5, %18 : vector<10x16xi1>, vector<10x16xi32>
    %cst_5 = arith.constant dense<2147483647> : vector<16xi32>
    %20 = vector.multi_reduction <minsi>, %19, %cst_5 [0] : vector<10x16xi32> to vector<16xi32>
    %21 = vector.shape_cast %20 : vector<16xi32> to vector<1x16xi32>
    %cst_6 = arith.constant dense<0xFF800000> : vector<16xf32>
    %22 = vector.multi_reduction <maximumf>, %4, %cst_6 [0] : vector<10x16xf32> to vector<16xf32>
    %23 = vector.shape_cast %22 : vector<16xf32> to vector<1x16xf32>
    %24 = vector.broadcast %23 : vector<1x16xf32> to vector<10x16xf32>
    %25 = arith.cmpf oeq, %4, %24 : vector<10x16xf32>
    %c10_i32_7 = arith.constant 10 : i32
    %26 = vector.broadcast %c10_i32_7 : i32 to vector<10x16xi32>
    %27 = arith.select %25, %5, %26 : vector<10x16xi1>, vector<10x16xi32>
    %cst_8 = arith.constant dense<2147483647> : vector<16xi32>
    %28 = vector.multi_reduction <minsi>, %27, %cst_8 [0] : vector<10x16xi32> to vector<16xi32>
    %29 = vector.shape_cast %28 : vector<16xi32> to vector<1x16xi32>
    %30 = arith.cmpi eq, %21, %29 : vector<1x16xi32>
    %c0_9 = arith.constant 0 : index
    %c0_10 = arith.constant 0 : index
    %31 = vector.load %arg5[%c0_9, %c0_10] : memref<1x16xf32, #tpu.memory_space<vmem>>, vector<1x16xf32>
    %32 = arith.andi %13, %30 : vector<1x16xi1>
    %cst_11 = arith.constant 1.000000e+00 : f32
    %cst_12 = arith.constant 0.000000e+00 : f32
    %33 = vector.broadcast %cst_11 : f32 to vector<1x16xf32>
    %34 = vector.broadcast %cst_12 : f32 to vector<1x16xf32>
    %35 = arith.select %32, %33, %34 : vector<1x16xi1>, vector<1x16xf32>
    %36 = arith.addf %31, %35 : vector<1x16xf32>
    %c0_13 = arith.constant 0 : index
    %c0_14 = arith.constant 0 : index
    %37 = vector.load %arg5[%c0_13, %c0_14] : memref<1x16xf32, #tpu.memory_space<vmem>>, vector<1x16xf32>
    tpu.vector_store %arg5[%c0_13, %c0_14], %36 {strides = array<i32>} : memref<1x16xf32, #tpu.memory_space<vmem>>, vector<1x16xf32>,
    %c0_i32_15 = arith.constant 0 : i32
    %38 = arith.cmpi eq, %arg1, %c0_i32_15 : i32
    %39 = arith.extui %38 : i1 to i32
    %c0_i32_16 = arith.constant 0 : i32
    %40 = arith.cmpi ne, %39, %c0_i32_16 : i32
    scf.if %40 {
      %cst_17 = arith.constant 0.000000e+00 : f32
      %41 = vector.broadcast %cst_17 : f32 to vector<1x8x128xf32>
      %c0_18 = arith.constant 0 : index
      %c0_19 = arith.constant 0 : index
      %42 = vector.load %arg5[%c0_18, %c0_19] : memref<1x16xf32, #tpu.memory_space<vmem>>, vector<1x16xf32>
      %43 = vector.shape_cast %42 : vector<1x16xf32> to vector<1x1x16xf32>
      %cst_20 = arith.constant dense<0.000000e+00> : vector<1xf32>
      %44 = vector.multi_reduction <add>, %43, %cst_20 [1, 2] : vector<1x1x16xf32> to vector<1xf32>
      %45 = vector.shape_cast %44 : vector<1xf32> to vector<1x1x1xf32>
      %46 = vector.extract %45[0, 0, 0] : f32 from vector<1x1x1xf32>
      %47 = vector.broadcast %46 : f32 to vector<1x8x128xf32>
      %48 = arith.addf %41, %47 : vector<1x8x128xf32>
      %c0_21 = arith.constant 0 : index
      %c0_22 = arith.constant 0 : index
      %c0_23 = arith.constant 0 : index
      %49 = vector.load %arg4[%c0_21, %c0_22, %c0_23] : memref<1x8x128xf32, #tpu.memory_space<vmem>>, vector<1x8x128xf32>
      tpu.vector_store %arg4[%c0_21, %c0_22, %c0_23], %48 {strides = array<i32>} : memref<1x8x128xf32, #tpu.memory_space<vmem>>, vector<1x8x128xf32>,
    } else {
    }
    return
  }
  func.func @transform_0(%arg0: i32, %arg1: i32) -> (i32, i32) {
    %c1_i32 = arith.constant 1 : i32
    %0 = arith.muli %arg0, %c1_i32 : i32
    %1 = arith.addi %0, %arg1 : i32
    %c0_i32 = arith.constant 0 : i32
    %2 = arith.minsi %1, %c0_i32 : i32
    %c0_i32_0 = arith.constant 0 : i32
    %c0_i32_1 = arith.constant 0 : i32
    return %c0_i32_0, %2 : i32, i32
  }
  func.func @transform_1(%arg0: i32, %arg1: i32) -> (i32, i32) {
    %c1_i32 = arith.constant 1 : i32
    %0 = arith.muli %arg0, %c1_i32 : i32
    %1 = arith.addi %0, %arg1 : i32
    %c0_i32 = arith.constant 0 : i32
    %2 = arith.minsi %1, %c0_i32 : i32
    %c0_i32_0 = arith.constant 0 : i32
    %c0_i32_1 = arith.constant 0 : i32
    return %c0_i32_0, %2 : i32, i32
  }
  func.func @transform_2(%arg0: i32, %arg1: i32) -> (i32, i32, i32) {
    %c0_i32 = arith.constant 0 : i32
    %c0_i32_0 = arith.constant 0 : i32
    %c0_i32_1 = arith.constant 0 : i32
    return %arg0, %c0_i32, %c0_i32_0 : i32, i32, i32
  }
}

</mosaic_0001>

<bundles_post_ra>
// kernel: tpu_custom_call.1
= control target key start
LH: loop header
LB: loop body
LE: loop exit
PB: predicated region body
PF: predicated region fallthrough
CT: control target
= control target key end

     0   :  { %7 = vsyncpa [#allocation4], 0  ;;  %s291_s0 = inlined_call_operand.hbm [shape: f32[10,16], index: 0, kind: input, shape index: {}]   ;;  %s292_s1 = inlined_call_operand.hbm [shape: f32[10,16], index: 1, kind: input, shape index: {}]   ;;  %s293_s2 = inlined_call_operand.hbm [shape: f32[1,8,128], index: 2, kind: output, shape index: {}]  }
   0x1   :  { %8 = vsyncpa [#allocation7], 0 }
   0x2   :  { %9 = vsyncpa [#allocation5], 0  ;;  %s248_s9 = smov [#allocation3]  }
   0x3   :  { %s20_s10 = sshll.u32 %s248_s9, 4  ;;  %s21_s10 = int_to_ptr.vmem [resolvable:$true] %s20_s10 }
   0x4   :  { %s190_s11 = scalar_lea.vmem %s21_s10, 256  ;;  %p195_p1 = scmp.lt.s32.totalorder %s21_s10, %s21_s10 }
   0x5   :  { %p191_p0 = scmp.ne.s32.totalorder %s21_s10, %s190_s11  ;;  %p196_p2 = scmp.lt.s32.totalorder %s190_s11, %s190_s11 }
   0x7   :  { %p197_p3 = por %p196_p2, %p195_p1 }
   0x9   :  { %p198_p4 = pnand %p197_p3, %p191_p0 }
   0xb   :  { %201 = shalt.err (!%p198_p4)
}
   0xc   :  { %s249_s12 = smov 128   ;;  %s250_s13 = smov 8  }
   0xd   :  { %26 = dma.hbm_to_vmem [thread:$0]  %s291_s0, 256, %s21_s10, [#allocation4], %s249_s12, %s249_s12, %s250_s13  }
   0xe   :  { %s251_s16 = smov [#allocation6]  }
   0xf   :  { %s37_s17 = sshll.u32 %s251_s16, 4  ;;  %s38_s17 = int_to_ptr.vmem [resolvable:$true] %s37_s17 }
  0x10   :  { %s210_s18 = scalar_lea.vmem %s38_s17, 256  ;;  %p215_p6 = scmp.lt.s32.totalorder %s38_s17, %s38_s17 }
  0x11   :  { %p211_p5 = scmp.ne.s32.totalorder %s38_s17, %s210_s18  ;;  %p216_p7 = scmp.lt.s32.totalorder %s210_s18, %s210_s18 }
  0x13   :  { %p217_p8 = por %p216_p7, %p215_p6 }
  0x15   :  { %p218_p9 = pnand %p217_p8, %p211_p5 }
  0x17   :  { %221 = shalt.err (!%p218_p9)
}
  0x18   :  { %43 = dma.hbm_to_vmem [thread:$0]  %s292_s1, 256, %s38_s17, [#allocation7], %s249_s12, %s249_s12, %s250_s13  }
  0x19   :  { %242 = dma.done.wait [#allocation4], 256  }
  0x1a   :  { %243 = vsyncadd [#allocation4], 4294967040 }
  0x1b   :  { %244 = dma.done.wait [#allocation7], 256  }
  0x1c   :  { %245 = vsyncadd [#allocation7], 4294967040  ;;  %vm60_vm0 = vcmask 122880   ;;  %v252_v0 = vmov 0.0   ;;  %vm76_vm1 = vcmask 130048   ;;  %vm78_vm2 = vcmask 123904  }
  0x1d   :  { %61 = vst.msk [vmem:[#allocation2] sm:$0x1] %vm60_vm0, %v252_v0  ;;  %v62_v1 = vld [vmem:[#allocation3] sm:$0xff]  ;;  %v63_v2 = vld [vmem:[#allocation3 + $0x8] sm:$0x3]  ;;  %v64_v3 = vld [vmem:[#allocation6] sm:$0xff]  ;;  %v66_v12 = vlaneseq }
  0x1e   :  { %v65_v4 = vld [vmem:[#allocation6 + $0x8] sm:$0x3]  ;;  %v77_v5 = vsel %vm76_vm1, %v62_v1, -inf  ;;  %v79_v6 = vsel %vm78_vm2, %v63_v2, -inf  ;;  %v104_v7 = vsel %vm76_vm1, %v64_v3, -inf  ;;  %s253_s0 = smov [#allocation8]  }
  0x1f   :  { %v80_v8 = vmax.f32 %v77_v5, %v79_v6  ;;  %v105_v9 = vsel %vm78_vm2, %v65_v4, -inf  ;;  %v67_v17 = vshrl.u32 %v66_v12, 7  ;;  %v71_v42 = vand.u32 127, %v66_v12  ;;  %s160_s1 = sshll.u32 %s253_s0, 4  ;;  %s161_s1 = int_to_ptr.vmem [resolvable:$true] %s160_s1 }
  0x20   :  { %v106_v10 = vmax.f32 %v104_v7, %v105_v9  ;;  %s222_s22 = scalar_lea.vmem %s161_s1, 128  ;;  %p227_p11 = scmp.lt.s32.totalorder %s161_s1, %s161_s1 }
  0x21   :  { %v81_v11 = vrot.slane %v80_v8, 4  ;;  %v68_v22 = vadd.s32 8, %v67_v17  ;;  %vm75_vm14 = vcmp.lt.s32.totalorder %v71_v42, 16  ;;  %p223_p10 = scmp.ne.s32.totalorder %s161_s1, %s222_s22  ;;  %p228_p12 = scmp.lt.s32.totalorder %s222_s22, %s222_s22 }
  0x22   :  { %v107_v13 = vrot.slane %v106_v10, 4 }
  0x23   :  { %v82_v14 = vmax.f32 %v80_v8, %v81_v11  ;;  %p229_p13 = por %p228_p12, %p227_p11 }
  0x24   :  { %v108_v15 = vmax.f32 %v106_v10, %v107_v13  ;;  %v131_v49 = vld [vmem:[#allocation2] sm:$0x1] }
  0x25   :  { %v83_v16 = vrot.slane %v82_v14, 2  ;;  %p230_p0 = pnand %p229_p13, %p223_p10 }
  0x26   :  { %v109_v18 = vrot.slane %v108_v15, 2 }
  0x27   :  { %v84_v19 = vmax.f32 %v82_v14, %v83_v16 }
  0x28   :  { %v110_v20 = vmax.f32 %v108_v15, %v109_v18 }
  0x29   :  { %v85_v21 = vrot.slane %v84_v19, 1 }
  0x2a   :  { %v111_v23 = vrot.slane %v110_v20, 1 }
  0x2b   :  { %v86_v24 = vmax.f32 %v84_v19, %v85_v21 }
  0x2c   :  { %v112_v25 = vmax.f32 %v110_v20, %v111_v23 }
  0x2d   :  { %vm87_vm3 = vcmp.eq.f32.partialorder %v62_v1, %v86_v24  ;;  %vm88_vm4 = vcmp.eq.f32.partialorder %v63_v2, %v86_v24 }
  0x2e   :  { %v89_v26 = vsel %vm87_vm3, %v67_v17, 10  ;;  %v90_v27 = vsel %vm88_vm4, %v68_v22, 10  ;;  %vm113_vm5 = vcmp.eq.f32.partialorder %v64_v3, %v112_v25  ;;  %vm114_vm6 = vcmp.eq.f32.partialorder %v65_v4, %v112_v25 }
  0x2f   :  { %v91_v28 = vsel %vm76_vm1, %v89_v26, 2147483647  ;;  %v92_v29 = vsel %vm78_vm2, %v90_v27, 2147483647  ;;  %v115_v30 = vsel %vm113_vm5, %v67_v17, 10  ;;  %v116_v31 = vsel %vm114_vm6, %v68_v22, 10 }
  0x30   :  { %vm93_vm7 = vcmp.lt.s32.totalorder %v91_v28, %v92_v29  ;;  %v117_v32 = vsel %vm76_vm1, %v115_v30, 2147483647  ;;  %v118_v33 = vsel %vm78_vm2, %v116_v31, 2147483647 }
  0x31   :  { %v94_v34 = vsel %vm93_vm7, %v91_v28, %v92_v29  ;;  %vm119_vm8 = vcmp.lt.s32.totalorder %v117_v32, %v118_v33 }
  0x32   :  { %v95_v35 = vrot.slane %v94_v34, 4  ;;  %v120_v36 = vsel %vm119_vm8, %v117_v32, %v118_v33 }
  0x33   :  { %v121_v37 = vrot.slane %v120_v36, 4 }
  0x34   :  { %vm96_vm9 = vcmp.lt.s32.totalorder %v94_v34, %v95_v35 }
  0x35   :  { %v97_v38 = vsel %vm96_vm9, %v94_v34, %v95_v35  ;;  %vm122_vm10 = vcmp.lt.s32.totalorder %v120_v36, %v121_v37 }
  0x36   :  { %v98_v39 = vrot.slane %v97_v38, 2  ;;  %v123_v40 = vsel %vm122_vm10, %v120_v36, %v121_v37 }
  0x37   :  { %v124_v41 = vrot.slane %v123_v40, 2 }
  0x38   :  { %vm99_vm11 = vcmp.lt.s32.totalorder %v97_v38, %v98_v39 }
  0x39   :  { %v100_v43 = vsel %vm99_vm11, %v97_v38, %v98_v39  ;;  %vm125_vm12 = vcmp.lt.s32.totalorder %v123_v40, %v124_v41 }
  0x3a   :  { %v101_v44 = vrot.slane %v100_v43, 1  ;;  %v126_v45 = vsel %vm125_vm12, %v123_v40, %v124_v41 }
  0x3b   :  { %v127_v46 = vrot.slane %v126_v45, 1 }
  0x3c   :  { %vm102_vm13 = vcmp.lt.s32.totalorder %v100_v43, %v101_v44 }
  0x3d   :  { %v103_v47 = vsel %vm102_vm13, %v100_v43, %v101_v44  ;;  %vm128_vm15 = vcmp.lt.s32.totalorder %v126_v45, %v127_v46 }
  0x3e   :  { %v129_v48 = vsel %vm128_vm15, %v126_v45, %v127_v46 }
  0x3f   :  { %vm130_vm1 = vcmp.eq.s32.totalorder %v103_v47, %v129_v48 }
  0x40   :  { %vm132_vm2 = vmand %vm75_vm14, %vm130_vm1 }
  0x41   :  { %v133_v50 = vsel %vm132_vm2, 1.0, %v252_v0 }
  0x42   :  { %v134_v51 = vadd.f32 %v133_v50, %v131_v49 }
  0x44   :  { %136 = vst.msk [vmem:[#allocation2] sm:$0x1] %vm60_vm0, %v134_v51 }
  0x4b   :  { %v140_v52 = vld [vmem:[#allocation2] sm:$0x1] }
  0x4c   :  { %v141_v53 = vsel %vm60_vm0, %v140_v52, 0.0 }
  0x4d   :  { %142 = vadd.xlane.f32.xlu0 %v141_v53 }
  0xd6   :  { %v143_v54 = vpop.xlane.xlu0 %142 }
  0xd7   :  { %v144_v55 = vrot.slane %v143_v54, 4 }
  0xd9   :  { %v145_v56 = vadd.f32 %v144_v55, %v143_v54 }
  0xdb   :  { %v146_v57 = vrot.slane %v145_v56, 2 }
  0xdd   :  { %v147_v58 = vadd.f32 %v146_v57, %v145_v56 }
  0xdf   :  { %v148_v59 = vrot.slane %v147_v58, 1 }
  0xe1   :  { %v149_v60 = vadd.f32 %v148_v59, %v147_v58 }
  0xe3   :  { %174 = vpush %v149_v60 }
 0x114   :  { %s175_s21 = spop %174 }
 0x115   :  { %v151_v61 = vstv %s175_s21 }
 0x116   :  { %153 = vst [vmem:[#allocation8] sm:$0xff] %v151_v61 }
 0x117   :  { %233 = shalt.err (!%p230_p0)
}
 0x118   :  { %163 = dma.vmem_to_hbm [thread:$0]  %s161_s1, 128, %s293_s2, [#allocation5]  }
 0x119   :  { %246 = dma.done.wait [#allocation5], 128  }
 0x11a   :  { %247 = vsyncadd [#allocation5], 4294967168 }
 0x11b   :  { %167 = vsyncpa [#allocation4], 1 }
 0x11c   :  { %168 = vsyncpa [#allocation7], 1 }
 0x11d   :  { %169 = vsyncpa [#allocation5], 1 }

</bundles_post_ra>
